<compile_context>
chip_gen: v6e
topology: v6e:2x2x1
jax: 0.10.0
libtpu: 0.0.40
codegen_flags: <defaults>
</compile_context>

<pallas_src>
import functools

import jax
import jax.numpy as jnp
from jax.experimental import pallas as pl
from jax.experimental.pallas import tpu as pltpu


def _full_spec(shape):
    # single grid step, block == full array (satisfies the (8,128) rule)
    return pl.BlockSpec(shape, lambda i: (0,) * len(shape))


# ----------------------------------------------------------------------------
# Fused kernel: encoders + all attention pairs, one lane-dense output slab
# ----------------------------------------------------------------------------
def _lamoi_fused_kernel(*refs, n, layer_counts, B, z_dim, d, ch, k, pairs):
    f32 = jnp.float32
    cd = ch * d

    # ---- unpack refs (inputs, then the single output) ----------------------
    it = iter(refs)
    x_refs = [next(it) for _ in range(n)]
    enc_w = []
    for i in range(n):
        enc_w.append([(next(it), next(it)) for _ in range(layer_counts[i])])
    bw_refs = [next(it) for _ in range(n)]          # blockdiag(W_i^T)  (cd, ch*k)
    bm_refs = [next(it) for _ in range(n)]          # concat of blockdiag(M)  (cd, (n-1)*cd)
    os_ref = next(it)                               # block-ones selector (cd, ch)
    whb_refs = {p: next(it) for p in pairs}         # blockdiag(wh)  (ch*k, ch)
    out_ref = next(it)                              # (B, (n + n*(n-1)) * z_dim)

    # ---- encoders: Linear + ReLU chain, channel-major output ---------------
    # The interleaved->channel-major permutation is folded into the last
    # layer's weight & bias (prepare_params), so CM[i][:, c*d+dd] = te_i[b,dd,c].
    CM = []
    for i in range(n):
        h = x_refs[i][...].astype(f32)
        for (wt_ref, b_ref) in enc_w[i]:
            y = jnp.dot(h, wt_ref[...], preferred_element_type=f32) + b_ref[...]
            h = jnp.maximum(y, 0.0)
        CM.append(h)

    OS = os_ref[...]

    # ---- per-omics precompute (shared across all pairs), single matmuls ----
    # HW[i][b, c*k+kk]  = (W_i @ te_i)[b, kk, c]
    # PMS_all[i]        = te_i^T @ M for every channel and every target pair
    HW = [jnp.dot(CM[i], bw_refs[i][...], preferred_element_type=f32)
          for i in range(n)]
    PMS_all = [jnp.dot(CM[i], bm_refs[i][...], preferred_element_type=f32)
               for i in range(n)]

    targets = [[j for j in range(n) if j != i] for i in range(n)]

    # ---- attention pairs; everything stays lane-dense ------------------------
    blocks = list(CM)                                # encodings first (channel-major)
    for (i, j) in pairs:
        t = targets[i].index(j)
        PMS = PMS_all[i][:, t * cd:(t + 1) * cd]     # (B, ch*d)
        HWs = HW[j] if i < j else HW[i]              # standalone term
        HWm = HW[i] if i < j else HW[j]              # affinity-multiplied term

        H_blocks = []
        for f in range(ch):
            Qf = CM[j][:, f * d:(f + 1) * d]                          # (B, d)
            # aff[b, c] = sum_ee PMS[b, c*d+ee] * te_j[b, ee, f]
            aff_f = jnp.dot(PMS * jnp.tile(Qf, (1, ch)), OS,
                            preferred_element_type=f32)               # (B, ch)
            Hf = HWs[:, f * k:(f + 1) * k]                            # (B, k)
            for c in range(ch):
                Hf = Hf + HWm[:, c * k:(c + 1) * k] * aff_f[:, c:c + 1]
            H_blocks.append(jnp.tanh(Hf))
        H_all = jnp.concatenate(H_blocks, axis=1)                     # (B, ch*k)

        # scores for all channels in one matmul; exact softmax over channels
        s = jnp.dot(H_all, whb_refs[(i, j)][...], preferred_element_type=f32)
        s = s - jnp.max(s, axis=1, keepdims=True)
        e = jnp.exp(s)
        A = e / jnp.sum(e, axis=1, keepdims=True)                     # (B, ch)

        att = jnp.concatenate(
            [A[:, f:f + 1] * CM[i][:, f * d:(f + 1) * d] for f in range(ch)],
            axis=1)                                                   # (B, z_dim) chan-major
        blocks.append(att)

    out_ref[...] = jnp.concatenate(blocks, axis=1).astype(out_ref.dtype)


# ----------------------------------------------------------------------------
# Host-side wrappers
# ----------------------------------------------------------------------------
def prepare_params(params, *, z_dim, channel):
    """One-time weight layout prep (transposes / permutations / block-diags)."""
    n = len(params["enc"])
    ch = channel
    d = z_dim // ch
    k = params["W"][0].shape[0]
    pairs = tuple((i, j) for i in range(n) for j in range(n) if i != j)

    # channel-major column c*d+dd sources interleaved column dd*ch+c
    src = jnp.array([(col % d) * ch + col // d for col in range(z_dim)],
                    dtype=jnp.int32)

    enc_prep = []
    for layers in params["enc"]:
        lp = []
        L = len(layers)
        for li, (w, b) in enumerate(layers):
            wt = jnp.asarray(w, jnp.float32).T
            bb = jnp.asarray(b, jnp.float32).reshape(1, -1)
            if li == L - 1:                     # fold de-interleave into last layer
                wt = wt[:, src]
                bb = bb[:, src]
            lp.append((wt, bb))
        enc_prep.append(lp)

    eye_ch = jnp.eye(ch, dtype=jnp.float32)
    BW = [jnp.kron(eye_ch, jnp.asarray(W, jnp.float32).T) for W in params["W"]]

    # per-source-omics lane-concatenated block-diag affinity matrices
    BM_src = []
    for i in range(n):
        bls = []
        for j in range(n):
            if j == i:
                continue
            if i < j:
                M = jnp.asarray(params["aff"][j - i - 1], jnp.float32)
            else:   # affinity[i][j] = swapaxes(affinity[j][i]) -> use M^T
                M = jnp.asarray(params["aff"][i - j - 1], jnp.float32).T
            bls.append(jnp.kron(eye_ch, M))
        BM_src.append(jnp.concatenate(bls, axis=1))          # (ch*d, (n-1)*ch*d)

    OS = jnp.kron(eye_ch, jnp.ones((d, 1), jnp.float32))     # (ch*d, ch)
    WHB = {(i, j): jnp.kron(eye_ch, jnp.asarray(params["W_h"][i][j], jnp.float32))
           for (i, j) in pairs}                               # (ch*k, ch)

    return {"n": n, "d": d, "ch": ch, "z_dim": z_dim, "k": k, "pairs": pairs,
            "enc": enc_prep, "BW": BW, "BM_src": BM_src, "OS": OS, "WHB": WHB}


def lamoi_forward(xs, prep):
    n, d, ch, Z, k = prep["n"], prep["d"], prep["ch"], prep["z_dim"], prep["k"]
    pairs = prep["pairs"]
    n_pairs = len(pairs)
    B = xs[0].shape[0]

    args = [jnp.asarray(x, jnp.float32) for x in xs]
    layer_counts = []
    for layers in prep["enc"]:
        layer_counts.append(len(layers))
        for (wt, b) in layers:
            args += [wt, b]
    args += list(prep["BW"])
    args += list(prep["BM_src"])
    args.append(prep["OS"])
    args += [prep["WHB"][p] for p in pairs]

    kern = functools.partial(
        _lamoi_fused_kernel, n=n, layer_counts=tuple(layer_counts), B=B,
        z_dim=Z, d=d, ch=ch, k=k, pairs=pairs)

    out_shape = jax.ShapeDtypeStruct((B, (n + n_pairs) * Z), jnp.float32)
    slab = pl.pallas_call(
        kern,
        out_shape=out_shape,
        grid=(1,),
        in_specs=[_full_spec(a.shape) for a in args],
        out_specs=_full_spec(out_shape.shape),
        compiler_params=pltpu.CompilerParams(dimension_semantics=("arbitrary",)),
    )(*args)

    # pure-layout re-interleave (channel-major -> original interleaved layout)
    def cm_to_interleaved(a):
        return a.reshape(B, ch, d).transpose(0, 2, 1).reshape(B, Z)

    encode = [cm_to_interleaved(slab[:, i * Z:(i + 1) * Z]) for i in range(n)]
    att = [cm_to_interleaved(slab[:, (n + p) * Z:(n + p + 1) * Z])
           for p in range(n_pairs)]
    concat_data = jnp.concatenate(att, axis=1)
    return encode, concat_data


# ----------------------------------------------------------------------------
# Pure-JAX reference mirroring the PyTorch code (validation only)
# ----------------------------------------------------------------------------
def lamoi_forward_ref(xs, params, *, z_dim, channel):
    n = len(xs)
    d = z_dim // channel
    encode = []
    for i, x in enumerate(xs):
        h = x
        for (w, b) in params["enc"][i]:
            h = jnp.maximum(h @ w.T + b, 0.0)
        encode.append(h)
    te = [e.reshape(-1, d, channel) for e in encode]
    aff = [[None] * n for _ in range(n)]
    att = []
    for i in range(n):
        index = 0
        for j in range(n):
            if i <= j:
                aff[i][j] = jnp.einsum("bdc,de,bef->bcf", te[i],
                                       params["aff"][index], te[j])
                Hij = jnp.tanh(jnp.einsum("kd,bdc->bkc", params["W"][j], te[j])
                               + jnp.einsum("kd,bdc,bcf->bkf", params["W"][i],
                                            te[i], aff[i][j]))
                if i < j:
                    index += 1
            else:
                aff[i][j] = jnp.swapaxes(aff[j][i], 1, 2)
                Hij = jnp.tanh(jnp.einsum("kd,bdc->bkc", params["W"][i], te[i])
                               + jnp.einsum("kd,bdc,bcf->bkf", params["W"][j],
                                            te[j], aff[i][j]))
            s = jnp.einsum("kl,bkc->blc", params["W_h"][i][j], Hij)
            Aij = jax.nn.softmax(s, axis=2)
            if i != j:
                att.append((Aij * te[i]).reshape(-1, z_dim))
    return encode, jnp.concatenate(att, axis=1)


# ----------------------------------------------------------------------------
# Deterministic parameter init (shapes from LAMOI.__init__)
# ----------------------------------------------------------------------------
def init_params(key, input_dim, h_dim, z_dim, k_att, channel):
    n = len(input_dim)
    d = z_dim // channel
    params = {"enc": [], "aff": [], "W": [], "W_h": []}
    for i in range(n):
        dims = [input_dim[i]] + list(h_dim[i]) + [z_dim]
        layers = []
        for li in range(len(dims) - 1):
            key, k1, k2 = jax.random.split(key, 3)
            w = jax.random.normal(k1, (dims[li + 1], dims[li]), jnp.float32) \
                * (1.0 / jnp.sqrt(dims[li]))
            b = 0.01 * jax.random.normal(k2, (dims[li + 1],), jnp.float32)
            layers.append((w, b))
        params["enc"].append(layers)
    for _ in range(n * (n - 1) // 2):                      # C(len(input_dim))
        key, k1 = jax.random.split(key)
        params["aff"].append(0.3 * jax.random.normal(k1, (d, d), jnp.float32))
    for _ in range(n):
        key, k1 = jax.random.split(key)
        params["W"].append(0.3 * jax.random.normal(k1, (k_att, d), jnp.float32))
    for i in range(n):
        row = []
        for j in range(n):
            key, k1 = jax.random.split(key)
            row.append(jax.random.normal(k1, (k_att, 1), jnp.float32))
        params["W_h"].append(row)
    return params


if __name__ == "__main__":
    key = jax.random.PRNGKey(0)
    B = 8                       # multiple of 8 (sublane) by design
    input_dim = [16, 12]
    h_dim = [[32, 16], [32, 16]]
    z_dim = 16
    channel = 2
    k_att = 8

    key, kp, kx0, kx1 = jax.random.split(key, 4)
    params = init_params(kp, input_dim, h_dim, z_dim, k_att, channel)
    x0 = jax.random.normal(kx0, (B, input_dim[0]), jnp.float32)
    x1 = jax.random.normal(kx1, (B, input_dim[1]), jnp.float32)
    xs = [x0, x1]

    prep = prepare_params(params, z_dim=z_dim, channel=channel)
    encode, concat_data = lamoi_forward(xs, prep)
    jax.block_until_ready(encode)
    jax.block_until_ready(concat_data)

    enc_ref, cat_ref = lamoi_forward_ref(xs, params, z_dim=z_dim, channel=channel)
    # tolerance covers default-precision TPU f32 matmul (bf16 passes); the
    # kernel uses an exact softmax, so any logic error would blow far past it.
    TOL = 2e-2
    for e, er in zip(encode, enc_ref):
        assert e.shape == er.shape
        assert jnp.allclose(e, er, atol=TOL, rtol=TOL)
    assert concat_data.shape == (B, len(xs) * (len(xs) - 1) * z_dim)
    assert jnp.allclose(concat_data, cat_ref, atol=TOL, rtol=TOL)
    print("KERNEL_OK")
</pallas_src>

<mosaic_0001>
module attributes {stable_mosaic.version = 11 : i64} {
  func.func @_lamoi_fused_kernel(%arg0: i32, %arg1: memref<8x16xf32, #tpu.memory_space<vmem>>, %arg2: memref<8x12xf32, #tpu.memory_space<vmem>>, %arg3: memref<16x32xf32, #tpu.memory_space<vmem>>, %arg4: memref<1x32xf32, #tpu.memory_space<vmem>>, %arg5: memref<32x16xf32, #tpu.memory_space<vmem>>, %arg6: memref<1x16xf32, #tpu.memory_space<vmem>>, %arg7: memref<16x16xf32, #tpu.memory_space<vmem>>, %arg8: memref<1x16xf32, #tpu.memory_space<vmem>>, %arg9: memref<12x32xf32, #tpu.memory_space<vmem>>, %arg10: memref<1x32xf32, #tpu.memory_space<vmem>>, %arg11: memref<32x16xf32, #tpu.memory_space<vmem>>, %arg12: memref<1x16xf32, #tpu.memory_space<vmem>>, %arg13: memref<16x16xf32, #tpu.memory_space<vmem>>, %arg14: memref<1x16xf32, #tpu.memory_space<vmem>>, %arg15: memref<16x16xf32, #tpu.memory_space<vmem>>, %arg16: memref<16x16xf32, #tpu.memory_space<vmem>>, %arg17: memref<16x16xf32, #tpu.memory_space<vmem>>, %arg18: memref<16x16xf32, #tpu.memory_space<vmem>>, %arg19: memref<16x2xf32, #tpu.memory_space<vmem>>, %arg20: memref<16x2xf32, #tpu.memory_space<vmem>>, %arg21: memref<16x2xf32, #tpu.memory_space<vmem>>, %arg22: memref<8x64xf32, #tpu.memory_space<vmem>>) attributes {dimension_semantics = [#tpu.dimension_semantics<arbitrary>], iteration_bounds = array<i64: 1>, scalar_prefetch = 0 : i64, scratch_operands = 0 : i64, tpu.core_type = #tpu.core_type<tc>, window_params = [{pipeline_mode = #tpu.pipeline_mode<synchronous>, transform_indices = @transform_0, window_bounds = array<i64: 8, 16>}, {pipeline_mode = #tpu.pipeline_mode<synchronous>, transform_indices = @transform_1, window_bounds = array<i64: 8, 12>}, {pipeline_mode = #tpu.pipeline_mode<synchronous>, transform_indices = @transform_2, window_bounds = array<i64: 16, 32>}, {pipeline_mode = #tpu.pipeline_mode<synchronous>, transform_indices = @transform_3, window_bounds = array<i64: 1, 32>}, {pipeline_mode = #tpu.pipeline_mode<synchronous>, transform_indices = @transform_4, window_bounds = array<i64: 32, 16>}, {pipeline_mode = #tpu.pipeline_mode<synchronous>, transform_indices = @transform_5, window_bounds = array<i64: 1, 16>}, {pipeline_mode = #tpu.pipeline_mode<synchronous>, transform_indices = @transform_6, window_bounds = array<i64: 16, 16>}, {pipeline_mode = #tpu.pipeline_mode<synchronous>, transform_indices = @transform_7, window_bounds = array<i64: 1, 16>}, {pipeline_mode = #tpu.pipeline_mode<synchronous>, transform_indices = @transform_8, window_bounds = array<i64: 12, 32>}, {pipeline_mode = #tpu.pipeline_mode<synchronous>, transform_indices = @transform_9, window_bounds = array<i64: 1, 32>}, {pipeline_mode = #tpu.pipeline_mode<synchronous>, transform_indices = @transform_10, window_bounds = array<i64: 32, 16>}, {pipeline_mode = #tpu.pipeline_mode<synchronous>, transform_indices = @transform_11, window_bounds = array<i64: 1, 16>}, {pipeline_mode = #tpu.pipeline_mode<synchronous>, transform_indices = @transform_12, window_bounds = array<i64: 16, 16>}, {pipeline_mode = #tpu.pipeline_mode<synchronous>, transform_indices = @transform_13, window_bounds = array<i64: 1, 16>}, {pipeline_mode = #tpu.pipeline_mode<synchronous>, transform_indices = @transform_14, window_bounds = array<i64: 16, 16>}, {pipeline_mode = #tpu.pipeline_mode<synchronous>, transform_indices = @transform_15, window_bounds = array<i64: 16, 16>}, {pipeline_mode = #tpu.pipeline_mode<synchronous>, transform_indices = @transform_16, window_bounds = array<i64: 16, 16>}, {pipeline_mode = #tpu.pipeline_mode<synchronous>, transform_indices = @transform_17, window_bounds = array<i64: 16, 16>}, {pipeline_mode = #tpu.pipeline_mode<synchronous>, transform_indices = @transform_18, window_bounds = array<i64: 16, 2>}, {pipeline_mode = #tpu.pipeline_mode<synchronous>, transform_indices = @transform_19, window_bounds = array<i64: 16, 2>}, {pipeline_mode = #tpu.pipeline_mode<synchronous>, transform_indices = @transform_20, window_bounds = array<i64: 16, 2>}, {pipeline_mode = #tpu.pipeline_mode<synchronous>, transform_indices = @transform_21, window_bounds = array<i64: 8, 64>}]} {
    %c0 = arith.constant 0 : index
    %c0_0 = arith.constant 0 : index
    %0 = vector.load %arg1[%c0, %c0_0] : memref<8x16xf32, #tpu.memory_space<vmem>>, vector<8x16xf32>
    %c0_1 = arith.constant 0 : index
    %c0_2 = arith.constant 0 : index
    %1 = vector.load %arg3[%c0_1, %c0_2] : memref<16x32xf32, #tpu.memory_space<vmem>>, vector<16x32xf32>
    %cst = arith.constant dense<0.000000e+00> : vector<8x32xf32>
    %2 = tpu.matmul %0, %1, %cst {dimension_numbers = #tpu.dot_dimension_numbers<[1], [0], [0], [1], [0, 0, 1, 1], [], []>} : vector<8x16xf32>, vector<16x32xf32>, vector<8x32xf32> -> vector<8x32xf32>
    %c0_3 = arith.constant 0 : index
    %c0_4 = arith.constant 0 : index
    %3 = vector.load %arg4[%c0_3, %c0_4] : memref<1x32xf32, #tpu.memory_space<vmem>>, vector<1x32xf32>
    %4 = vector.broadcast %3 : vector<1x32xf32> to vector<8x32xf32>
    %5 = arith.addf %2, %4 : vector<8x32xf32>
    %cst_5 = arith.constant 0.000000e+00 : f32
    %6 = vector.broadcast %cst_5 : f32 to vector<8x32xf32>
    %7 = arith.maximumf %5, %6 : vector<8x32xf32>
    %c0_6 = arith.constant 0 : index
    %c0_7 = arith.constant 0 : index
    %8 = vector.load %arg5[%c0_6, %c0_7] : memref<32x16xf32, #tpu.memory_space<vmem>>, vector<32x16xf32>
    %cst_8 = arith.constant dense<0.000000e+00> : vector<8x16xf32>
    %9 = tpu.matmul %7, %8, %cst_8 {dimension_numbers = #tpu.dot_dimension_numbers<[1], [0], [0], [1], [0, 0, 1, 1], [], []>} : vector<8x32xf32>, vector<32x16xf32>, vector<8x16xf32> -> vector<8x16xf32>
    %c0_9 = arith.constant 0 : index
    %c0_10 = arith.constant 0 : index
    %10 = vector.load %arg6[%c0_9, %c0_10] : memref<1x16xf32, #tpu.memory_space<vmem>>, vector<1x16xf32>
    %11 = vector.broadcast %10 : vector<1x16xf32> to vector<8x16xf32>
    %12 = arith.addf %9, %11 : vector<8x16xf32>
    %cst_11 = arith.constant 0.000000e+00 : f32
    %13 = vector.broadcast %cst_11 : f32 to vector<8x16xf32>
    %14 = arith.maximumf %12, %13 : vector<8x16xf32>
    %c0_12 = arith.constant 0 : index
    %c0_13 = arith.constant 0 : index
    %15 = vector.load %arg7[%c0_12, %c0_13] : memref<16x16xf32, #tpu.memory_space<vmem>>, vector<16x16xf32>
    %cst_14 = arith.constant dense<0.000000e+00> : vector<8x16xf32>
    %16 = tpu.matmul %14, %15, %cst_14 {dimension_numbers = #tpu.dot_dimension_numbers<[1], [0], [0], [1], [0, 0, 1, 1], [], []>} : vector<8x16xf32>, vector<16x16xf32>, vector<8x16xf32> -> vector<8x16xf32>
    %c0_15 = arith.constant 0 : index
    %c0_16 = arith.constant 0 : index
    %17 = vector.load %arg8[%c0_15, %c0_16] : memref<1x16xf32, #tpu.memory_space<vmem>>, vector<1x16xf32>
    %18 = vector.broadcast %17 : vector<1x16xf32> to vector<8x16xf32>
    %19 = arith.addf %16, %18 : vector<8x16xf32>
    %cst_17 = arith.constant 0.000000e+00 : f32
    %20 = vector.broadcast %cst_17 : f32 to vector<8x16xf32>
    %21 = arith.maximumf %19, %20 : vector<8x16xf32>
    %c0_18 = arith.constant 0 : index
    %c0_19 = arith.constant 0 : index
    %22 = vector.load %arg2[%c0_18, %c0_19] : memref<8x12xf32, #tpu.memory_space<vmem>>, vector<8x12xf32>
    %c0_20 = arith.constant 0 : index
    %c0_21 = arith.constant 0 : index
    %23 = vector.load %arg9[%c0_20, %c0_21] : memref<12x32xf32, #tpu.memory_space<vmem>>, vector<12x32xf32>
    %cst_22 = arith.constant dense<0.000000e+00> : vector<8x32xf32>
    %24 = tpu.matmul %22, %23, %cst_22 {dimension_numbers = #tpu.dot_dimension_numbers<[1], [0], [0], [1], [0, 0, 1, 1], [], []>} : vector<8x12xf32>, vector<12x32xf32>, vector<8x32xf32> -> vector<8x32xf32>
    %c0_23 = arith.constant 0 : index
    %c0_24 = arith.constant 0 : index
    %25 = vector.load %arg10[%c0_23, %c0_24] : memref<1x32xf32, #tpu.memory_space<vmem>>, vector<1x32xf32>
    %26 = vector.broadcast %25 : vector<1x32xf32> to vector<8x32xf32>
    %27 = arith.addf %24, %26 : vector<8x32xf32>
    %cst_25 = arith.constant 0.000000e+00 : f32
    %28 = vector.broadcast %cst_25 : f32 to vector<8x32xf32>
    %29 = arith.maximumf %27, %28 : vector<8x32xf32>
    %c0_26 = arith.constant 0 : index
    %c0_27 = arith.constant 0 : index
    %30 = vector.load %arg11[%c0_26, %c0_27] : memref<32x16xf32, #tpu.memory_space<vmem>>, vector<32x16xf32>
    %cst_28 = arith.constant dense<0.000000e+00> : vector<8x16xf32>
    %31 = tpu.matmul %29, %30, %cst_28 {dimension_numbers = #tpu.dot_dimension_numbers<[1], [0], [0], [1], [0, 0, 1, 1], [], []>} : vector<8x32xf32>, vector<32x16xf32>, vector<8x16xf32> -> vector<8x16xf32>
    %c0_29 = arith.constant 0 : index
    %c0_30 = arith.constant 0 : index
    %32 = vector.load %arg12[%c0_29, %c0_30] : memref<1x16xf32, #tpu.memory_space<vmem>>, vector<1x16xf32>
    %33 = vector.broadcast %32 : vector<1x16xf32> to vector<8x16xf32>
    %34 = arith.addf %31, %33 : vector<8x16xf32>
    %cst_31 = arith.constant 0.000000e+00 : f32
    %35 = vector.broadcast %cst_31 : f32 to vector<8x16xf32>
    %36 = arith.maximumf %34, %35 : vector<8x16xf32>
    %c0_32 = arith.constant 0 : index
    %c0_33 = arith.constant 0 : index
    %37 = vector.load %arg13[%c0_32, %c0_33] : memref<16x16xf32, #tpu.memory_space<vmem>>, vector<16x16xf32>
    %cst_34 = arith.constant dense<0.000000e+00> : vector<8x16xf32>
    %38 = tpu.matmul %36, %37, %cst_34 {dimension_numbers = #tpu.dot_dimension_numbers<[1], [0], [0], [1], [0, 0, 1, 1], [], []>} : vector<8x16xf32>, vector<16x16xf32>, vector<8x16xf32> -> vector<8x16xf32>
    %c0_35 = arith.constant 0 : index
    %c0_36 = arith.constant 0 : index
    %39 = vector.load %arg14[%c0_35, %c0_36] : memref<1x16xf32, #tpu.memory_space<vmem>>, vector<1x16xf32>
    %40 = vector.broadcast %39 : vector<1x16xf32> to vector<8x16xf32>
    %41 = arith.addf %38, %40 : vector<8x16xf32>
    %cst_37 = arith.constant 0.000000e+00 : f32
    %42 = vector.broadcast %cst_37 : f32 to vector<8x16xf32>
    %43 = arith.maximumf %41, %42 : vector<8x16xf32>
    %c0_38 = arith.constant 0 : index
    %c0_39 = arith.constant 0 : index
    %44 = vector.load %arg19[%c0_38, %c0_39] : memref<16x2xf32, #tpu.memory_space<vmem>>, vector<16x2xf32>
    %c0_40 = arith.constant 0 : index
    %c0_41 = arith.constant 0 : index
    %45 = vector.load %arg15[%c0_40, %c0_41] : memref<16x16xf32, #tpu.memory_space<vmem>>, vector<16x16xf32>
    %cst_42 = arith.constant dense<0.000000e+00> : vector<8x16xf32>
    %46 = tpu.matmul %21, %45, %cst_42 {dimension_numbers = #tpu.dot_dimension_numbers<[1], [0], [0], [1], [0, 0, 1, 1], [], []>} : vector<8x16xf32>, vector<16x16xf32>, vector<8x16xf32> -> vector<8x16xf32>
    %c0_43 = arith.constant 0 : index
    %c0_44 = arith.constant 0 : index
    %47 = vector.load %arg16[%c0_43, %c0_44] : memref<16x16xf32, #tpu.memory_space<vmem>>, vector<16x16xf32>
    %cst_45 = arith.constant dense<0.000000e+00> : vector<8x16xf32>
    %48 = tpu.matmul %43, %47, %cst_45 {dimension_numbers = #tpu.dot_dimension_numbers<[1], [0], [0], [1], [0, 0, 1, 1], [], []>} : vector<8x16xf32>, vector<16x16xf32>, vector<8x16xf32> -> vector<8x16xf32>
    %c0_46 = arith.constant 0 : index
    %c0_47 = arith.constant 0 : index
    %49 = vector.load %arg17[%c0_46, %c0_47] : memref<16x16xf32, #tpu.memory_space<vmem>>, vector<16x16xf32>
    %cst_48 = arith.constant dense<0.000000e+00> : vector<8x16xf32>
    %50 = tpu.matmul %21, %49, %cst_48 {dimension_numbers = #tpu.dot_dimension_numbers<[1], [0], [0], [1], [0, 0, 1, 1], [], []>} : vector<8x16xf32>, vector<16x16xf32>, vector<8x16xf32> -> vector<8x16xf32>
    %c0_49 = arith.constant 0 : index
    %c0_50 = arith.constant 0 : index
    %51 = vector.load %arg18[%c0_49, %c0_50] : memref<16x16xf32, #tpu.memory_space<vmem>>, vector<16x16xf32>
    %cst_51 = arith.constant dense<0.000000e+00> : vector<8x16xf32>
    %52 = tpu.matmul %43, %51, %cst_51 {dimension_numbers = #tpu.dot_dimension_numbers<[1], [0], [0], [1], [0, 0, 1, 1], [], []>} : vector<8x16xf32>, vector<16x16xf32>, vector<8x16xf32> -> vector<8x16xf32>
    %53 = vector.extract_strided_slice %43 {offsets = [0, 0], sizes = [8, 8], strides = [1, 1]} : vector<8x16xf32> to vector<8x8xf32>
    %54 = tpu.concatenate %53, %53 in 1 : vector<8x8xf32>, vector<8x8xf32> -> vector<8x16xf32>
    %55 = arith.mulf %50, %54 : vector<8x16xf32>
    %cst_52 = arith.constant dense<0.000000e+00> : vector<8x2xf32>
    %56 = tpu.matmul %55, %44, %cst_52 {dimension_numbers = #tpu.dot_dimension_numbers<[1], [0], [0], [1], [0, 0, 1, 1], [], []>} : vector<8x16xf32>, vector<16x2xf32>, vector<8x2xf32> -> vector<8x2xf32>
    %57 = vector.extract_strided_slice %48 {offsets = [0, 0], sizes = [8, 8], strides = [1, 1]} : vector<8x16xf32> to vector<8x8xf32>
    %58 = vector.extract_strided_slice %46 {offsets = [0, 0], sizes = [8, 8], strides = [1, 1]} : vector<8x16xf32> to vector<8x8xf32>
    %59 = vector.extract_strided_slice %56 {offsets = [0, 0], sizes = [8, 1], strides = [1, 1]} : vector<8x2xf32> to vector<8x1xf32>
    %60 = vector.broadcast %59 : vector<8x1xf32> to vector<8x8xf32>
    %61 = arith.mulf %58, %60 : vector<8x8xf32>
    %62 = arith.addf %57, %61 : vector<8x8xf32>
    %63 = vector.extract_strided_slice %46 {offsets = [0, 8], sizes = [8, 8], strides = [1, 1]} : vector<8x16xf32> to vector<8x8xf32>
    %64 = vector.extract_strided_slice %56 {offsets = [0, 1], sizes = [8, 1], strides = [1, 1]} : vector<8x2xf32> to vector<8x1xf32>
    %65 = vector.broadcast %64 : vector<8x1xf32> to vector<8x8xf32>
    %66 = arith.mulf %63, %65 : vector<8x8xf32>
    %67 = arith.addf %62, %66 : vector<8x8xf32>
    %68 = math.tanh %67 : vector<8x8xf32>
    %69 = vector.extract_strided_slice %43 {offsets = [0, 8], sizes = [8, 8], strides = [1, 1]} : vector<8x16xf32> to vector<8x8xf32>
    %70 = tpu.concatenate %69, %69 in 1 : vector<8x8xf32>, vector<8x8xf32> -> vector<8x16xf32>
    %71 = arith.mulf %50, %70 : vector<8x16xf32>
    %cst_53 = arith.constant dense<0.000000e+00> : vector<8x2xf32>
    %72 = tpu.matmul %71, %44, %cst_53 {dimension_numbers = #tpu.dot_dimension_numbers<[1], [0], [0], [1], [0, 0, 1, 1], [], []>} : vector<8x16xf32>, vector<16x2xf32>, vector<8x2xf32> -> vector<8x2xf32>
    %73 = vector.extract_strided_slice %48 {offsets = [0, 8], sizes = [8, 8], strides = [1, 1]} : vector<8x16xf32> to vector<8x8xf32>
    %74 = vector.extract_strided_slice %46 {offsets = [0, 0], sizes = [8, 8], strides = [1, 1]} : vector<8x16xf32> to vector<8x8xf32>
    %75 = vector.extract_strided_slice %72 {offsets = [0, 0], sizes = [8, 1], strides = [1, 1]} : vector<8x2xf32> to vector<8x1xf32>
    %76 = vector.broadcast %75 : vector<8x1xf32> to vector<8x8xf32>
    %77 = arith.mulf %74, %76 : vector<8x8xf32>
    %78 = arith.addf %73, %77 : vector<8x8xf32>
    %79 = vector.extract_strided_slice %46 {offsets = [0, 8], sizes = [8, 8], strides = [1, 1]} : vector<8x16xf32> to vector<8x8xf32>
    %80 = vector.extract_strided_slice %72 {offsets = [0, 1], sizes = [8, 1], strides = [1, 1]} : vector<8x2xf32> to vector<8x1xf32>
    %81 = vector.broadcast %80 : vector<8x1xf32> to vector<8x8xf32>
    %82 = arith.mulf %79, %81 : vector<8x8xf32>
    %83 = arith.addf %78, %82 : vector<8x8xf32>
    %84 = math.tanh %83 : vector<8x8xf32>
    %85 = tpu.concatenate %68, %84 in 1 : vector<8x8xf32>, vector<8x8xf32> -> vector<8x16xf32>
    %c0_54 = arith.constant 0 : index
    %c0_55 = arith.constant 0 : index
    %86 = vector.load %arg20[%c0_54, %c0_55] : memref<16x2xf32, #tpu.memory_space<vmem>>, vector<16x2xf32>
    %cst_56 = arith.constant dense<0.000000e+00> : vector<8x2xf32>
    %87 = tpu.matmul %85, %86, %cst_56 {dimension_numbers = #tpu.dot_dimension_numbers<[1], [0], [0], [1], [0, 0, 1, 1], [], []>} : vector<8x16xf32>, vector<16x2xf32>, vector<8x2xf32> -> vector<8x2xf32>
    %cst_57 = arith.constant dense<0xFF800000> : vector<8xf32>
    %88 = vector.multi_reduction <maximumf>, %87, %cst_57 [1] : vector<8x2xf32> to vector<8xf32>
    %89 = vector.shape_cast %88 : vector<8xf32> to vector<8x1xf32>
    %90 = vector.broadcast %89 : vector<8x1xf32> to vector<8x2xf32>
    %91 = arith.subf %87, %90 : vector<8x2xf32>
    %92 = math.exp %91 : vector<8x2xf32>
    %cst_58 = arith.constant dense<0.000000e+00> : vector<8xf32>
    %93 = vector.multi_reduction <add>, %92, %cst_58 [1] : vector<8x2xf32> to vector<8xf32>
    %94 = vector.shape_cast %93 : vector<8xf32> to vector<8x1xf32>
    %95 = vector.broadcast %94 : vector<8x1xf32> to vector<8x2xf32>
    %96 = arith.divf %92, %95 : vector<8x2xf32>
    %97 = vector.extract_strided_slice %96 {offsets = [0, 0], sizes = [8, 1], strides = [1, 1]} : vector<8x2xf32> to vector<8x1xf32>
    %98 = vector.extract_strided_slice %21 {offsets = [0, 0], sizes = [8, 8], strides = [1, 1]} : vector<8x16xf32> to vector<8x8xf32>
    %99 = vector.broadcast %97 : vector<8x1xf32> to vector<8x8xf32>
    %100 = arith.mulf %99, %98 : vector<8x8xf32>
    %101 = vector.extract_strided_slice %96 {offsets = [0, 1], sizes = [8, 1], strides = [1, 1]} : vector<8x2xf32> to vector<8x1xf32>
    %102 = vector.extract_strided_slice %21 {offsets = [0, 8], sizes = [8, 8], strides = [1, 1]} : vector<8x16xf32> to vector<8x8xf32>
    %103 = vector.broadcast %101 : vector<8x1xf32> to vector<8x8xf32>
    %104 = arith.mulf %103, %102 : vector<8x8xf32>
    %105 = tpu.concatenate %100, %104 in 1 : vector<8x8xf32>, vector<8x8xf32> -> vector<8x16xf32>
    %106 = vector.extract_strided_slice %21 {offsets = [0, 0], sizes = [8, 8], strides = [1, 1]} : vector<8x16xf32> to vector<8x8xf32>
    %107 = tpu.concatenate %106, %106 in 1 : vector<8x8xf32>, vector<8x8xf32> -> vector<8x16xf32>
    %108 = arith.mulf %52, %107 : vector<8x16xf32>
    %cst_59 = arith.constant dense<0.000000e+00> : vector<8x2xf32>
    %109 = tpu.matmul %108, %44, %cst_59 {dimension_numbers = #tpu.dot_dimension_numbers<[1], [0], [0], [1], [0, 0, 1, 1], [], []>} : vector<8x16xf32>, vector<16x2xf32>, vector<8x2xf32> -> vector<8x2xf32>
    %110 = vector.extract_strided_slice %48 {offsets = [0, 0], sizes = [8, 8], strides = [1, 1]} : vector<8x16xf32> to vector<8x8xf32>
    %111 = vector.extract_strided_slice %46 {offsets = [0, 0], sizes = [8, 8], strides = [1, 1]} : vector<8x16xf32> to vector<8x8xf32>
    %112 = vector.extract_strided_slice %109 {offsets = [0, 0], sizes = [8, 1], strides = [1, 1]} : vector<8x2xf32> to vector<8x1xf32>
    %113 = vector.broadcast %112 : vector<8x1xf32> to vector<8x8xf32>
    %114 = arith.mulf %111, %113 : vector<8x8xf32>
    %115 = arith.addf %110, %114 : vector<8x8xf32>
    %116 = vector.extract_strided_slice %46 {offsets = [0, 8], sizes = [8, 8], strides = [1, 1]} : vector<8x16xf32> to vector<8x8xf32>
    %117 = vector.extract_strided_slice %109 {offsets = [0, 1], sizes = [8, 1], strides = [1, 1]} : vector<8x2xf32> to vector<8x1xf32>
    %118 = vector.broadcast %117 : vector<8x1xf32> to vector<8x8xf32>
    %119 = arith.mulf %116, %118 : vector<8x8xf32>
    %120 = arith.addf %115, %119 : vector<8x8xf32>
    %121 = math.tanh %120 : vector<8x8xf32>
    %122 = vector.extract_strided_slice %21 {offsets = [0, 8], sizes = [8, 8], strides = [1, 1]} : vector<8x16xf32> to vector<8x8xf32>
    %123 = tpu.concatenate %122, %122 in 1 : vector<8x8xf32>, vector<8x8xf32> -> vector<8x16xf32>
    %124 = arith.mulf %52, %123 : vector<8x16xf32>
    %cst_60 = arith.constant dense<0.000000e+00> : vector<8x2xf32>
    %125 = tpu.matmul %124, %44, %cst_60 {dimension_numbers = #tpu.dot_dimension_numbers<[1], [0], [0], [1], [0, 0, 1, 1], [], []>} : vector<8x16xf32>, vector<16x2xf32>, vector<8x2xf32> -> vector<8x2xf32>
    %126 = vector.extract_strided_slice %48 {offsets = [0, 8], sizes = [8, 8], strides = [1, 1]} : vector<8x16xf32> to vector<8x8xf32>
    %127 = vector.extract_strided_slice %46 {offsets = [0, 0], sizes = [8, 8], strides = [1, 1]} : vector<8x16xf32> to vector<8x8xf32>
    %128 = vector.extract_strided_slice %125 {offsets = [0, 0], sizes = [8, 1], strides = [1, 1]} : vector<8x2xf32> to vector<8x1xf32>
    %129 = vector.broadcast %128 : vector<8x1xf32> to vector<8x8xf32>
    %130 = arith.mulf %127, %129 : vector<8x8xf32>
    %131 = arith.addf %126, %130 : vector<8x8xf32>
    %132 = vector.extract_strided_slice %46 {offsets = [0, 8], sizes = [8, 8], strides = [1, 1]} : vector<8x16xf32> to vector<8x8xf32>
    %133 = vector.extract_strided_slice %125 {offsets = [0, 1], sizes = [8, 1], strides = [1, 1]} : vector<8x2xf32> to vector<8x1xf32>
    %134 = vector.broadcast %133 : vector<8x1xf32> to vector<8x8xf32>
    %135 = arith.mulf %132, %134 : vector<8x8xf32>
    %136 = arith.addf %131, %135 : vector<8x8xf32>
    %137 = math.tanh %136 : vector<8x8xf32>
    %138 = tpu.concatenate %121, %137 in 1 : vector<8x8xf32>, vector<8x8xf32> -> vector<8x16xf32>
    %c0_61 = arith.constant 0 : index
    %c0_62 = arith.constant 0 : index
    %139 = vector.load %arg21[%c0_61, %c0_62] : memref<16x2xf32, #tpu.memory_space<vmem>>, vector<16x2xf32>
    %cst_63 = arith.constant dense<0.000000e+00> : vector<8x2xf32>
    %140 = tpu.matmul %138, %139, %cst_63 {dimension_numbers = #tpu.dot_dimension_numbers<[1], [0], [0], [1], [0, 0, 1, 1], [], []>} : vector<8x16xf32>, vector<16x2xf32>, vector<8x2xf32> -> vector<8x2xf32>
    %cst_64 = arith.constant dense<0xFF800000> : vector<8xf32>
    %141 = vector.multi_reduction <maximumf>, %140, %cst_64 [1] : vector<8x2xf32> to vector<8xf32>
    %142 = vector.shape_cast %141 : vector<8xf32> to vector<8x1xf32>
    %143 = vector.broadcast %142 : vector<8x1xf32> to vector<8x2xf32>
    %144 = arith.subf %140, %143 : vector<8x2xf32>
    %145 = math.exp %144 : vector<8x2xf32>
    %cst_65 = arith.constant dense<0.000000e+00> : vector<8xf32>
    %146 = vector.multi_reduction <add>, %145, %cst_65 [1] : vector<8x2xf32> to vector<8xf32>
    %147 = vector.shape_cast %146 : vector<8xf32> to vector<8x1xf32>
    %148 = vector.broadcast %147 : vector<8x1xf32> to vector<8x2xf32>
    %149 = arith.divf %145, %148 : vector<8x2xf32>
    %150 = vector.extract_strided_slice %149 {offsets = [0, 0], sizes = [8, 1], strides = [1, 1]} : vector<8x2xf32> to vector<8x1xf32>
    %151 = vector.extract_strided_slice %43 {offsets = [0, 0], sizes = [8, 8], strides = [1, 1]} : vector<8x16xf32> to vector<8x8xf32>
    %152 = vector.broadcast %150 : vector<8x1xf32> to vector<8x8xf32>
    %153 = arith.mulf %152, %151 : vector<8x8xf32>
    %154 = vector.extract_strided_slice %149 {offsets = [0, 1], sizes = [8, 1], strides = [1, 1]} : vector<8x2xf32> to vector<8x1xf32>
    %155 = vector.extract_strided_slice %43 {offsets = [0, 8], sizes = [8, 8], strides = [1, 1]} : vector<8x16xf32> to vector<8x8xf32>
    %156 = vector.broadcast %154 : vector<8x1xf32> to vector<8x8xf32>
    %157 = arith.mulf %156, %155 : vector<8x8xf32>
    %158 = tpu.concatenate %153, %157 in 1 : vector<8x8xf32>, vector<8x8xf32> -> vector<8x16xf32>
    %159 = tpu.concatenate %21, %43, %105, %158 in 1 : vector<8x16xf32>, vector<8x16xf32>, vector<8x16xf32>, vector<8x16xf32> -> vector<8x64xf32>
    %c0_66 = arith.constant 0 : index
    %c0_67 = arith.constant 0 : index
    %160 = vector.load %arg22[%c0_66, %c0_67] : memref<8x64xf32, #tpu.memory_space<vmem>>, vector<8x64xf32>
    tpu.vector_store %arg22[%c0_66, %c0_67], %159 {strides = array<i32>} : memref<8x64xf32, #tpu.memory_space<vmem>>, vector<8x64xf32>,
    return
  }
  func.func @transform_0(%arg0: i32) -> (i32, i32) {
    %c0_i32 = arith.constant 0 : i32
    %c0_i32_0 = arith.constant 0 : i32
    %c0_i32_1 = arith.constant 0 : i32
    return %c0_i32, %c0_i32_0 : i32, i32
  }
  func.func @transform_1(%arg0: i32) -> (i32, i32) {
    %c0_i32 = arith.constant 0 : i32
    %c0_i32_0 = arith.constant 0 : i32
    %c0_i32_1 = arith.constant 0 : i32
    return %c0_i32, %c0_i32_0 : i32, i32
  }
  func.func @transform_2(%arg0: i32) -> (i32, i32) {
    %c0_i32 = arith.constant 0 : i32
    %c0_i32_0 = arith.constant 0 : i32
    %c0_i32_1 = arith.constant 0 : i32
    return %c0_i32, %c0_i32_0 : i32, i32
  }
  func.func @transform_3(%arg0: i32) -> (i32, i32) {
    %c0_i32 = arith.constant 0 : i32
    %c0_i32_0 = arith.constant 0 : i32
    %c0_i32_1 = arith.constant 0 : i32
    return %c0_i32, %c0_i32_0 : i32, i32
  }
  func.func @transform_4(%arg0: i32) -> (i32, i32) {
    %c0_i32 = arith.constant 0 : i32
    %c0_i32_0 = arith.constant 0 : i32
    %c0_i32_1 = arith.constant 0 : i32
    return %c0_i32, %c0_i32_0 : i32, i32
  }
  func.func @transform_5(%arg0: i32) -> (i32, i32) {
    %c0_i32 = arith.constant 0 : i32
    %c0_i32_0 = arith.constant 0 : i32
    %c0_i32_1 = arith.constant 0 : i32
    return %c0_i32, %c0_i32_0 : i32, i32
  }
  func.func @transform_6(%arg0: i32) -> (i32, i32) {
    %c0_i32 = arith.constant 0 : i32
    %c0_i32_0 = arith.constant 0 : i32
    %c0_i32_1 = arith.constant 0 : i32
    return %c0_i32, %c0_i32_0 : i32, i32
  }
  func.func @transform_7(%arg0: i32) -> (i32, i32) {
    %c0_i32 = arith.constant 0 : i32
    %c0_i32_0 = arith.constant 0 : i32
    %c0_i32_1 = arith.constant 0 : i32
    return %c0_i32, %c0_i32_0 : i32, i32
  }
  func.func @transform_8(%arg0: i32) -> (i32, i32) {
    %c0_i32 = arith.constant 0 : i32
    %c0_i32_0 = arith.constant 0 : i32
    %c0_i32_1 = arith.constant 0 : i32
    return %c0_i32, %c0_i32_0 : i32, i32
  }
  func.func @transform_9(%arg0: i32) -> (i32, i32) {
    %c0_i32 = arith.constant 0 : i32
    %c0_i32_0 = arith.constant 0 : i32
    %c0_i32_1 = arith.constant 0 : i32
    return %c0_i32, %c0_i32_0 : i32, i32
  }
  func.func @transform_10(%arg0: i32) -> (i32, i32) {
    %c0_i32 = arith.constant 0 : i32
    %c0_i32_0 = arith.constant 0 : i32
    %c0_i32_1 = arith.constant 0 : i32
    return %c0_i32, %c0_i32_0 : i32, i32
  }
  func.func @transform_11(%arg0: i32) -> (i32, i32) {
    %c0_i32 = arith.constant 0 : i32
    %c0_i32_0 = arith.constant 0 : i32
    %c0_i32_1 = arith.constant 0 : i32
    return %c0_i32, %c0_i32_0 : i32, i32
  }
  func.func @transform_12(%arg0: i32) -> (i32, i32) {
    %c0_i32 = arith.constant 0 : i32
    %c0_i32_0 = arith.constant 0 : i32
    %c0_i32_1 = arith.constant 0 : i32
    return %c0_i32, %c0_i32_0 : i32, i32
  }
  func.func @transform_13(%arg0: i32) -> (i32, i32) {
    %c0_i32 = arith.constant 0 : i32
    %c0_i32_0 = arith.constant 0 : i32
    %c0_i32_1 = arith.constant 0 : i32
    return %c0_i32, %c0_i32_0 : i32, i32
  }
  func.func @transform_14(%arg0: i32) -> (i32, i32) {
    %c0_i32 = arith.constant 0 : i32
    %c0_i32_0 = arith.constant 0 : i32
    %c0_i32_1 = arith.constant 0 : i32
    return %c0_i32, %c0_i32_0 : i32, i32
  }
  func.func @transform_15(%arg0: i32) -> (i32, i32) {
    %c0_i32 = arith.constant 0 : i32
    %c0_i32_0 = arith.constant 0 : i32
    %c0_i32_1 = arith.constant 0 : i32
    return %c0_i32, %c0_i32_0 : i32, i32
  }
  func.func @transform_16(%arg0: i32) -> (i32, i32) {
    %c0_i32 = arith.constant 0 : i32
    %c0_i32_0 = arith.constant 0 : i32
    %c0_i32_1 = arith.constant 0 : i32
    return %c0_i32, %c0_i32_0 : i32, i32
  }
  func.func @transform_17(%arg0: i32) -> (i32, i32) {
    %c0_i32 = arith.constant 0 : i32
    %c0_i32_0 = arith.constant 0 : i32
    %c0_i32_1 = arith.constant 0 : i32
    return %c0_i32, %c0_i32_0 : i32, i32
  }
  func.func @transform_18(%arg0: i32) -> (i32, i32) {
    %c0_i32 = arith.constant 0 : i32
    %c0_i32_0 = arith.constant 0 : i32
    %c0_i32_1 = arith.constant 0 : i32
    return %c0_i32, %c0_i32_0 : i32, i32
  }
  func.func @transform_19(%arg0: i32) -> (i32, i32) {
    %c0_i32 = arith.constant 0 : i32
    %c0_i32_0 = arith.constant 0 : i32
    %c0_i32_1 = arith.constant 0 : i32
    return %c0_i32, %c0_i32_0 : i32, i32
  }
  func.func @transform_20(%arg0: i32) -> (i32, i32) {
    %c0_i32 = arith.constant 0 : i32
    %c0_i32_0 = arith.constant 0 : i32
    %c0_i32_1 = arith.constant 0 : i32
    return %c0_i32, %c0_i32_0 : i32, i32
  }
  func.func @transform_21(%arg0: i32) -> (i32, i32) {
    %c0_i32 = arith.constant 0 : i32
    %c0_i32_0 = arith.constant 0 : i32
    %c0_i32_1 = arith.constant 0 : i32
    return %c0_i32, %c0_i32_0 : i32, i32
  }
}

</mosaic_0001>

<bundles_post_ra>
// kernel: tpu_custom_call.1
= control target key start
LH: loop header
LB: loop body
LE: loop exit
PB: predicated region body
PF: predicated region fallthrough
CT: control target
= control target key end

     0   :  { %s2356_s0 = inlined_call_operand.hbm [shape: f32[8,16], index: 0, kind: input, shape index: {}]   ;;  %s2357_s1 = inlined_call_operand.hbm [shape: f32[8,12], index: 1, kind: input, shape index: {}]   ;;  %s2358_s2 = inlined_call_operand.vmem [shape: f32[16,32], index: 2, kind: input, shape index: {}]   ;;  %s2359_s3 = inlined_call_operand.hbm [shape: f32[1,32], index: 3, kind: input, shape index: {}]   ;;  %s2360_s4 = inlined_call_operand.vmem [shape: f32[32,16], index: 4, kind: input, shape index: {}]   ;;  %s2361_s5 = inlined_call_operand.hbm [shape: f32[1,16], index: 5, kind: input, shape index: {}]   ;;  %s2362_s6 = inlined_call_operand.vmem [shape: f32[16,16], index: 6, kind: input, shape index: {}]   ;;  %s2363_s7 = inlined_call_operand.hbm [shape: f32[1,16], index: 7, kind: input, shape index: {}]   ;;  %s2364_s8 = inlined_call_operand.vmem [shape: f32[12,32], index: 8, kind: input, shape index: {}]   ;;  %s2365_s9 = inlined_call_operand.hbm [shape: f32[1,32], index: 9, kind: input, shape index: {}]   ;;  %s2366_s10 = inlined_call_operand.vmem [shape: f32[32,16], index: 10, kind: input, shape index: {}]   ;;  %s2367_s11 = inlined_call_operand.vmem [shape: f32[1,16], index: 11, kind: input, shape index: {}]   ;;  %s2368_s12 = inlined_call_operand.vmem [shape: f32[16,16], index: 12, kind: input, shape index: {}]   ;;  %s2369_s13 = inlined_call_operand.vmem [shape: f32[1,16], index: 13, kind: input, shape index: {}]   ;;  %s2370_s14 = inlined_call_operand.vmem [shape: f32[16,16], index: 14, kind: input, shape index: {}]   ;;  %s2371_s15 = inlined_call_operand.vmem [shape: f32[16,16], index: 15, kind: input, shape index: {}]   ;;  %s2372_s16 = inlined_call_operand.vmem [shape: f32[16,16], index: 16, kind: input, shape index: {}]   ;;  %s2373_s17 = inlined_call_operand.vmem [shape: f32[16,16], index: 17, kind: input, shape index: {}]   ;;  %s2374_s18 = inlined_call_operand.vmem [shape: f32[16,2], index: 18, kind: input, shape index: {}]   ;;  %s2375_s19 = inlined_call_operand.vmem [shape: f32[16,2], index: 19, kind: input, shape index: {}]   ;;  %s2376_s20 = inlined_call_operand.vmem [shape: f32[16,2], index: 20, kind: input, shape index: {}]   ;;  %s2377_s21 = inlined_call_operand.hbm [shape: f32[8,64], index: 21, kind: output, shape index: {}]  }
   0x1   :  { %2380 = sst [smem:[#allocation19_spill]] %s2356_s0 }
   0x2   :  { %2381 = sst [smem:[#allocation20_spill]] %s2357_s1 }
   0x3   :  { %2382 = sst [smem:[#allocation21_spill]] %s2358_s2 }
   0x4   :  { %2383 = sst [smem:[#allocation22_spill]] %s2359_s3 }
   0x5   :  { %2384 = sst [smem:[#allocation23_spill]] %s2360_s4 }
   0x6   :  { %2385 = sst [smem:[#allocation24_spill]] %s2361_s5 }
   0x7   :  { %26 = vsyncpa [#allocation3], 0 }
   0x8   :  { %27 = vsyncpa [#allocation6], 0 }
   0x9   :  { %28 = vsyncpa [#allocation9], 0 }
   0xa   :  { %29 = vsyncpa [#allocation12], 0 }
   0xb   :  { %30 = vsyncpa [#allocation4], 0  ;;  %s1950_s2 = smov [#allocation5]   ;;  %s1951_s26 = smov [#allocation8]  }
   0xc   :  { %s47_s25 = sshll.u32 %s1950_s2, 4  ;;  %s71_s27 = sshll.u32 %s1951_s26, 4  ;;  %s48_s25 = int_to_ptr.vmem [resolvable:$true] %s47_s25  ;;  %s72_s27 = int_to_ptr.vmem [resolvable:$true] %s71_s27 }
   0xd   :  { %s1808_s3 = scalar_lea.vmem %s48_s25, 128  ;;  %p1813_p1 = scmp.lt.s32.totalorder %s48_s25, %s48_s25 }
   0xe   :  { %p1809_p0 = scmp.ne.s32.totalorder %s48_s25, %s1808_s3  ;;  %p1814_p2 = scmp.lt.s32.totalorder %s1808_s3, %s1808_s3 }
  0x10   :  { %p1815_p3 = por %p1814_p2, %p1813_p1 }
  0x12   :  { %p1816_p4 = pnand %p1815_p3, %p1809_p0 }
  0x14   :  { %1819 = shalt.err (!%p1816_p4)
}
  0x15   :  { %s2386_s0 = sld [smem:[#allocation20_spill]]  ;;  %s1828_s4 = scalar_lea.vmem %s72_s27, 16 }
  0x16   :  { %p1829_p5 = scmp.ne.s32.totalorder %s72_s27, %s1828_s4  ;;  %s1832_s30 = scalar_lea.vmem %s72_s27, 32 }
  0x17   :  { %p1833_p6 = scmp.lt.s32.totalorder %s72_s27, %s72_s27  ;;  %p1834_p7 = scmp.lt.s32.totalorder %s1832_s30, %s1828_s4 }
  0x19   :  { %p1835_p8 = por %p1834_p7, %p1833_p6 }
  0x1b   :  { %50 = dma.hbm_to_vmem [thread:$0]  %s2386_s0, 128, %s48_s25, [#allocation6]  }
  0x1c   :  { %p1836_p9 = pnand %p1835_p8, %p1829_p5 }
  0x1e   :  { %1839 = shalt.err (!%p1836_p9)
}
  0x1f   :  { %s2387_s23 = sld [smem:[#allocation24_spill]]  ;;  %s1952_s1 = smov [#allocation2]  }
  0x20   :  { %s37_s24 = sshll.u32 %s1952_s1, 4  ;;  %s1953_s2 = smov [#allocation7]   ;;  %s38_s24 = int_to_ptr.vmem [resolvable:$true] %s37_s24 }
  0x21   :  { %s59_s26 = sshll.u32 %s1953_s2, 4  ;;  %s1848_s3 = scalar_lea.vmem %s38_s24, 128  ;;  %s60_s26 = int_to_ptr.vmem [resolvable:$true] %s59_s26 }
  0x22   :  { %p1849_p10 = scmp.ne.s32.totalorder %s38_s24, %s1848_s3  ;;  %p1853_p11 = scmp.lt.s32.totalorder %s38_s24, %s38_s24 }
  0x23   :  { %p1854_p12 = scmp.lt.s32.totalorder %s1848_s3, %s1848_s3 }
  0x25   :  { %74 = dma.hbm_to_vmem [thread:$0]  %s2387_s23, 16, %s72_s27, [#allocation9]  }
  0x26   :  { %p1855_p13 = por %p1854_p12, %p1853_p11 }
  0x28   :  { %p1856_p0 = pnand %p1855_p13, %p1849_p10 }
  0x2a   :  { %1859 = shalt.err (!%p1856_p0)
}
  0x2b   :  { %s2388_s29 = sld [smem:[#allocation19_spill]]  ;;  %s1868_s0 = scalar_lea.vmem %s60_s26, 16 }
  0x2c   :  { %p1869_p1 = scmp.ne.s32.totalorder %s60_s26, %s1868_s0  ;;  %s1872_s27 = scalar_lea.vmem %s60_s26, 32 }
  0x2d   :  { %p1873_p2 = scmp.lt.s32.totalorder %s60_s26, %s60_s26  ;;  %p1874_p3 = scmp.lt.s32.totalorder %s1872_s27, %s1868_s0 }
  0x2f   :  { %p1875_p4 = por %p1874_p3, %p1873_p2 }
  0x31   :  { %40 = dma.hbm_to_vmem [thread:$0]  %s2388_s29, 128, %s38_s24, [#allocation3]  }
  0x32   :  { %p1876_p5 = pnand %p1875_p4, %p1869_p1 }
  0x34   :  { %1879 = shalt.err (!%p1876_p5)
}
  0x35   :  { %s2389_s5 = sld [smem:[#allocation22_spill]]  ;;  %s1954_s22 = smov [#allocation10]  }
  0x36   :  { %s83_s23 = sshll.u32 %s1954_s22, 4  ;;  %s1955_s1 = smov [#allocation11]   ;;  %s84_s23 = int_to_ptr.vmem [resolvable:$true] %s83_s23 }
  0x37   :  { %s95_s2 = sshll.u32 %s1955_s1, 4  ;;  %s1888_s3 = scalar_lea.vmem %s84_s23, 16  ;;  %s96_s2 = int_to_ptr.vmem [resolvable:$true] %s95_s2 }
  0x38   :  { %p1889_p6 = scmp.ne.s32.totalorder %s84_s23, %s1888_s3  ;;  %s1892_s24 = scalar_lea.vmem %s84_s23, 32 }
  0x39   :  { %p1893_p7 = scmp.lt.s32.totalorder %s84_s23, %s84_s23  ;;  %p1894_p8 = scmp.lt.s32.totalorder %s1892_s24, %s1888_s3 }
  0x3b   :  { %62 = dma.hbm_to_vmem [thread:$0]  %s2389_s5, 16, %s60_s26, [#allocation6]  }
  0x3c   :  { %p1895_p9 = por %p1894_p8, %p1893_p7 }
  0x3e   :  { %p1896_p10 = pnand %p1895_p9, %p1889_p6 }
  0x40   :  { %1899 = shalt.err (!%p1896_p10)
}
  0x41   :  { %86 = dma.hbm_to_vmem [thread:$0]  %s2363_s7, 16, %s84_s23, [#allocation9]  }
  0x42   :  { %s1908_s29 = scalar_lea.vmem %s96_s2, 16  ;;  %s1912_s26 = scalar_lea.vmem %s96_s2, 32 }
  0x43   :  { %p1909_p11 = scmp.ne.s32.totalorder %s96_s2, %s1908_s29  ;;  %p1913_p12 = scmp.lt.s32.totalorder %s96_s2, %s96_s2 }
  0x44   :  { %p1914_p13 = scmp.lt.s32.totalorder %s1912_s26, %s1908_s29 }
  0x46   :  { %p1915_p0 = por %p1914_p13, %p1913_p12 }
  0x48   :  { %p1916_p1 = pnand %p1915_p0, %p1909_p11 }
  0x4a   :  { %1919 = shalt.err (!%p1916_p1)
}
  0x4b   :  { %98 = dma.hbm_to_vmem [thread:$0]  %s2365_s9, 16, %s96_s2, [#allocation12]  }
  0x4c   :  { %1940 = dma.done.wait [#allocation3], 128  }
  0x4d   :  { %1941 = vsyncadd [#allocation3], 4294967168 }
  0x4e   :  { %1942 = dma.done.wait [#allocation6], 144  }
  0x4f   :  { %1943 = vsyncadd [#allocation6], 4294967152 }
  0x50   :  { %1944 = dma.done.wait [#allocation9], 32  }
  0x51   :  { %1945 = vsyncadd [#allocation9], 4294967264 }
  0x52   :  { %1946 = dma.done.wait [#allocation12], 16  }
  0x53   :  { %1947 = vsyncadd [#allocation12], 4294967280  ;;  %v1956_v0 = vmov 0.0   ;;  %vm1957_vm0 = vmmov 0   ;;  %s2390_s4 = sld [smem:[#allocation21_spill]]  ;;  %v139_v3 = vld [vmem:[#allocation2] sm:$0xff] }
  0x54   :  { %1640 = vmatprep.subr.mxu0 %v1956_v0  ;;  %1644 = vmatprep.mubr.msk.f32.mxu0 %vm1957_vm0, %v1956_v0  ;;  %vm149_vm1 = vcmask 130048   ;;  %s2391_s1 = sld [smem:[#allocation23_spill]]  ;;  %v1565_v8 = vld [vmem:[#allocation7] ss:$0 sm:$0xff]  ;;  %vm235_vm2 = vcmask 261120   ;;  %v311_v13 = vld [vmem:[%s2362_s6 + $0x8] sm:$0xff] }
  0x55   :  { %1647 = vmatprep.subr.mxu1 %v1956_v0  ;;  %1655 = vmatprep.mubr.msk.f32.mxu1 %vm1957_vm0, %v1956_v0  ;;  %v310_v14 = vld [vmem:[%s2362_s6] sm:$0xff]  ;;  %v1567_v15 = vld [vmem:[#allocation8] ss:$0 sm:$0xff]  ;;  %v395_v20 = vld [vmem:[%s2364_s8 + $0x8] sm:$0xf]  ;;  %vm407_vm3 = vcmask 1043456  }
  0x56   :  { %v394_v21 = vld [vmem:[%s2364_s8] sm:$0xff]  ;;  %v393_v22 = vld [vmem:[#allocation5] sm:$0xff]  ;;  %vm403_vm4 = vcmask 97280   ;;  %v485_v23 = vld [vmem:[%s2366_s10 + $0x18] sm:$0xff]  ;;  %v1960_v63 = vmov 0   ;;  %vm949_vm5 = vcmask 64512  }
  0x57   :  { %v484_v24 = vld [vmem:[%s2366_s10 + $0x10] sm:$0xff]  ;;  %v483_v25 = vld [vmem:[%s2366_s10 + $0x8] sm:$0xff]  ;;  %v482_v26 = vld [vmem:[%s2366_s10] sm:$0xff]  ;;  %s1959_s10 = smov 8   ;;  %1776 = vset.pattern.permute.xlu1 %v1960_v63  ;;  %1778 = vset.pattern.permute.xlu0 %v1960_v63  ;;  %vm1215_vm6 = vcmask 15360   ;;  %s1963_s9 = smov 32  }
  0x58   :  { %v1571_v29 = vld [vmem:[#allocation11] ss:$0 sm:$0xff]  ;;  %v568_v34 = vld [vmem:[%s2368_s12 + $0x8] sm:$0xff]  ;;  %v567_v35 = vld [vmem:[%s2368_s12] sm:$0xff]  ;;  %vm1543_vm7 = vcmask 392192   ;;  %vm1545_vm8 = vcmask 523264  }
  0x59   :  { %v141_v1 = vld [vmem:[%s2390_s4 + $0x8] sm:$0xff]  ;;  %v140_v2 = vld [vmem:[%s2390_s4] sm:$0xff]  ;;  %v1569_v37 = vld [vmem:[#allocation10] ss:$0 sm:$0xff]  ;;  %s1965_s4 = smov [#allocation13]  }
  0x5a   :  { %1641 = vmatpush3.msra.mxu0 %v141_v1  ;;  %v227_v4 = vld [vmem:[%s2391_s1 + $0x18] sm:$0xff]  ;;  %v226_v5 = vld [vmem:[%s2391_s1 + $0x10] sm:$0xff]  ;;  %v225_v6 = vld [vmem:[%s2391_s1 + $0x8] sm:$0xff]  ;;  %s1553_s30 = sshll.u32 %s1965_s4, 4  ;;  %s1554_s30 = int_to_ptr.vmem [resolvable:$true] %s1553_s30 }
  0x5b   :  { %1642 = vmatprep.subr.mxu0 %v1956_v0  ;;  %1648 = vmatpush3.msra.mxu1 %v227_v4  ;;  %v224_v7 = vld [vmem:[%s2391_s1] sm:$0xff]  ;;  %v653_v43 = vld [vmem:[%s2370_s14 + $0x8] sm:$0xff]  ;;  %p1925_p3 = scmp.lt.s32.totalorder %s1554_s30, %s1554_s30 }
  0x5c   :  { %1643 = vmatpush3.msra.mxu0 %v140_v2  ;;  %1649 = vmatprep.subr.mxu1 %v1956_v0  ;;  %v1574_v36 = vld [vmem:[%s2367_s11] ss:$0 sm:$0xff]  ;;  %v803_v46 = vld [vmem:[%s2372_s16 + $0x8] sm:$0xff]  ;;  %s1964_s11 = smov 48  }
  0x5d   :  { %1645 = vmatmul.mubr.msk.f32.vlgmr.msra.gmra.mxu0 %vm149_vm1, %v139_v3  ;;  %1658 = vmatprep.subr.mxu0 %v1956_v0  ;;  %v652_v44 = vld [vmem:[%s2370_s14] sm:$0xff]  ;;  %v728_v48 = vld [vmem:[%s2371_s15 + $0x8] sm:$0xff]  ;;  %s1920_s14 = scalar_lea.vmem %s1554_s30, 128 }
  0x5e   :  { %1662 = vmatprep.mubr.msk.f32.mxu0 %vm1957_vm0, %v1956_v0  ;;  %1650 = vmatpush3.msra.mxu1 %v226_v5  ;;  %v802_v47 = vld [vmem:[%s2372_s16] sm:$0xff]  ;;  %v2221_v50 = vld [vmem:[%s2374_s18 + $0x8] sm:$0xff]  ;;  %p1921_p2 = scmp.ne.s32.totalorder %s1554_s30, %s1920_s14  ;;  %p1926_p4 = scmp.lt.s32.totalorder %s1920_s14, %s1920_s14 }
  0x5f   :  { %1651 = vmatprep.subr.mxu1 %v1956_v0  ;;  %1659 = vmatpush3.msra.mxu0 %v311_v13  ;;  %v727_v49 = vld [vmem:[%s2371_s15] sm:$0xff]  ;;  %v875_v57 = vld [vmem:[%s2373_s17 + $0x8] sm:$0xff] }
  0x60   :  { %1652 = vmatpush3.msra.mxu1 %v225_v6  ;;  %1660 = vmatprep.subr.mxu0 %v1956_v0  ;;  %v2227_v51 = vld [vmem:[%s2374_s18] sm:$0xff]  ;;  %s1958_s18 = smov 120   ;;  %p1927_p5 = por %p1926_p4, %p1925_p3 }
  0x61   :  { %1653 = vmatprep.subr.mxu1 %v1956_v0  ;;  %1661 = vmatpush3.msra.mxu0 %v310_v14  ;;  %v1576_v52 = vld [vmem:[%s2369_s13] ss:$0 sm:$0xff]  ;;  %v1961_v14 = vmov 1  }
  0x62   :  { %1654 = vmatpush3.msra.mxu1 %v224_v7  ;;  %1665 = vmatprep.subr.mxu0 %v1956_v0  ;;  %v874_v59 = vld [vmem:[%s2373_s17] sm:$0xff]  ;;  %p1928_p6 = pnand %p1927_p5, %p1921_p2 }
  0x63   :  { %1672 = vmatprep.subr.mxu1 %v1956_v0 }
 0x11d   :  { %v219_v9 = vpop.f32.mrf.mxu0 }
 0x11e   :  { %v220_v10 = vadd.f32 %v1565_v8, %v219_v9 }
 0x11f   :  { %v1646_v11 = vpop.f32.mrf.mxu0 }
 0x120   :  { %v223_v12 = vmax.f32 %v220_v10, 0.0 }
 0x122   :  { %1656 = vmatmul.mubr.msk.f32.vlgmr.msra.gmra.mxu1 %vm235_vm2, %v223_v12 }
 0x123   :  { %1680 = vmatprep.mubr.msk.f32.mxu1 %vm1957_vm0, %v1956_v0  ;;  %1673 = vmatpush3.msra.mxu1 %v485_v23 }
 0x124   :  { %1674 = vmatprep.subr.mxu1 %v1956_v0 }
 0x125   :  { %1675 = vmatpush3.msra.mxu1 %v484_v24 }
 0x126   :  { %1676 = vmatprep.subr.mxu1 %v1956_v0 }
 0x127   :  { %1677 = vmatpush3.msra.mxu1 %v483_v25 }
 0x128   :  { %1678 = vmatprep.subr.mxu1 %v1956_v0 }
 0x129   :  { %1679 = vmatpush3.msra.mxu1 %v482_v26 }
 0x12a   :  { %1697 = vmatprep.subr.mxu1 %v1956_v0 }
 0x1e2   :  { %v305_v16 = vpop.f32.mrf.mxu1 }
 0x1e3   :  { %v306_v17 = vadd.f32 %v1567_v15, %v305_v16 }
 0x1e4   :  { %v1657_v18 = vpop.f32.mrf.mxu1 }
 0x1e5   :  { %v309_v19 = vmax.f32 %v306_v17, 0.0  ;;  %v1141_v18 = vld [vmem:[%s2375_s19 + $0x8] sm:$0xff] }
 0x1e7   :  { %1663 = vmatmul.mubr.msk.f32.vlgmr.msra.gmra.mxu0 %vm149_vm1, %v309_v19  ;;  %v1140_v19 = vld [vmem:[%s2375_s19] sm:$0xff] }
 0x1e8   :  { %1666 = vmatpush3.msk.msra.mxu0 %vm407_vm3, %v395_v20  ;;  %1669 = vmatprep.mubr.msk.f32.mxu0 %vm1957_vm0, %v1956_v0 }
 0x1e9   :  { %1667 = vmatprep.subr.mxu0 %v1956_v0 }
 0x1ea   :  { %1668 = vmatpush3.msra.mxu0 %v394_v21 }
 0x1eb   :  { %1670 = vmatmul.mubr.msk.f32.vlgmr.msra.gmra.mxu0 %vm403_vm4, %v393_v22  ;;  %1683 = vmatprep.subr.mxu0 %v1956_v0 }
 0x1ec   :  { %1687 = vmatprep.mubr.msk.f32.mxu0 %vm1957_vm0, %v1956_v0  ;;  %1684 = vmatpush3.msra.mxu0 %v568_v34 }
 0x1ed   :  { %1685 = vmatprep.subr.mxu0 %v1956_v0 }
 0x1ee   :  { %1686 = vmatpush3.msra.mxu0 %v567_v35 }
 0x1ef   :  { %1690 = vmatprep.subr.mxu0 %v1956_v0 }
 0x2a7   :  { %v388_v27 = vpop.f32.mrf.mxu0 }
 0x2a8   :  { %v389_v41 = vadd.f32 %v1569_v37, %v388_v27 }
 0x2a9   :  { %v1664_v28 = vpop.f32.mrf.mxu0 }
 0x2aa   :  { %v2190_v45 = vmax.f32 %v389_v41, 0.0 }
 0x2ab   :  { %v477_v30 = vpop.f32.mrf.mxu0 }
 0x2ac   :  { %v478_v31 = vadd.f32 %v1571_v29, %v477_v30 }
 0x2ad   :  { %v1671_v32 = vpop.f32.mrf.mxu0 }
 0x2ae   :  { %v481_v33 = vmax.f32 %v478_v31, 0.0 }
 0x2b0   :  { %1681 = vmatmul.mubr.msk.f32.vlgmr.msra.gmra.mxu1 %vm235_vm2, %v481_v33 }
 0x2b1   :  { %1701 = vmatprep.mubr.msk.f32.mxu1 %vm1957_vm0, %v1956_v0  ;;  %1698 = vmatpush3.msra.mxu1 %v728_v48 }
 0x2b2   :  { %1699 = vmatprep.subr.mxu1 %v1956_v0 }
 0x2b3   :  { %1700 = vmatpush3.msra.mxu1 %v727_v49 }
 0x2b4   :  { %1711 = vmatprep.subr.mxu1 %v1956_v0 }
 0x370   :  { %v562_v38 = vpop.f32.mrf.mxu1 }
 0x371   :  { %v563_v39 = vadd.f32 %v1574_v36, %v562_v38 }
 0x372   :  { %v1682_v40 = vpop.f32.mrf.mxu1 }
 0x373   :  { %v566_v42 = vmax.f32 %v563_v39, 0.0 }
 0x375   :  { %1688 = vmatmul.mubr.msk.f32.vlgmr.msra.gmra.mxu0 %vm149_vm1, %v566_v42 }
 0x376   :  { %1691 = vmatpush3.msra.mxu0 %v653_v43  ;;  %1694 = vmatprep.mubr.msk.f32.mxu0 %vm1957_vm0, %v1956_v0 }
 0x377   :  { %1692 = vmatprep.subr.mxu0 %v1956_v0 }
 0x378   :  { %1693 = vmatpush3.msra.mxu0 %v652_v44 }
 0x379   :  { %1695 = vmatmul.mubr.msk.f32.vlgmr.msra.gmra.mxu0 %vm149_vm1, %v2190_v45  ;;  %1704 = vmatprep.subr.mxu0 %v1956_v0 }
 0x37a   :  { %1705 = vmatpush3.msra.mxu0 %v803_v46  ;;  %1708 = vmatprep.mubr.msk.f32.mxu0 %vm1957_vm0, %v1956_v0 }
 0x37b   :  { %1706 = vmatprep.subr.mxu0 %v1956_v0 }
 0x37c   :  { %1707 = vmatpush3.msra.mxu0 %v802_v47 }
 0x37d   :  { %1709 = vmatmul.mubr.msk.f32.vlgmr.msra.gmra.mxu0 %vm149_vm1, %v2190_v45  ;;  %1718 = vmatprep.subr.mxu0 %v1956_v0 }
 0x37e   :  { %1722 = vmatprep.mubr.msk.f32.mxu0 %vm1957_vm0, %v1956_v0  ;;  %1719 = vmatpush3.msra.mxu0 %v2221_v50 }
 0x37f   :  { %1720 = vmatprep.subr.mxu0 %v1956_v0 }
 0x380   :  { %1721 = vmatpush3.msra.mxu0 %v2227_v51 }
 0x381   :  { %1732 = vmatprep.subr.mxu0 %v1956_v0 }
 0x435   :  { %v645_v53 = vpop.f32.mrf.mxu0 }
 0x436   :  { %v646_v54 = vadd.f32 %v1576_v52, %v645_v53 }
 0x437   :  { %v1689_v55 = vpop.f32.mrf.mxu0 }
 0x438   :  { %v2235_v56 = vmax.f32 %v646_v54, 0.0 }
 0x439   :  { %v2240_v58 = vpop.f32.mrf.mxu0 }
 0x43a   :  { %1043 = vrot.lane.b32.xlu0 %v2235_v56, %s1958_s18  ;;  %1702 = vmatmul.mubr.msk.f32.vlgmr.msra.gmra.mxu1 %vm149_vm1, %v2235_v56 }
 0x43b   :  { %v1696_v60 = vpop.f32.mrf.mxu0  ;;  %1712 = vmatpush3.msra.mxu1 %v875_v57  ;;  %1715 = vmatprep.mubr.msk.f32.mxu1 %vm1957_vm0, %v1956_v0 }
 0x43c   :  { %1713 = vmatprep.subr.mxu1 %v1956_v0 }
 0x43d   :  { %v870_v61 = vpop.f32.mrf.mxu0  ;;  %1714 = vmatpush3.msra.mxu1 %v874_v59 }
 0x43e   :  { %946 = vrot.lane.b32.xlu0 %v2235_v56, %s1959_s10  ;;  %1716 = vmatmul.mubr.msk.f32.vlgmr.msra.gmra.mxu1 %vm149_vm1, %v2235_v56 }
 0x43f   :  { %v1710_v62 = vpop.f32.mrf.mxu0  ;;  %1725 = vmatprep.subr.mxu1 %v1956_v0  ;;  %1729 = vmatprep.mubr.msk.f32.mxu1 %vm1957_vm0, %v1956_v0 }
 0x440   :  { %1726 = vmatpush3.msra.mxu1 %v2221_v50 }
 0x441   :  { %1727 = vmatprep.subr.mxu1 %v1956_v0 }
 0x442   :  { %1728 = vmatpush3.msra.mxu1 %v2227_v51 }
 0x443   :  { %1739 = vmatprep.subr.mxu1 %v1956_v0 }
 0x4ac   :  { %v1044_v1 = vpop.permute.xlu0 %1043 }
 0x4ad   :  { %v1046_v2 = vsel %vm949_vm5, %v1044_v1, %v2235_v56 }
 0x4ae   :  { %v1047_v3 = vmul.f32 %v1046_v2, %v870_v61 }
 0x4b0   :  { %v947_v4 = vpop.permute.xlu0 %946  ;;  %1730 = vmatmul.mubr.msk.f32.vlgmr.msra.gmra.mxu1 %vm149_vm1, %v1047_v3 }
 0x4b1   :  { %v950_v5 = vsel %vm949_vm5, %v2235_v56, %v947_v4  ;;  %1740 = vmatpush3.msra.mxu1 %v2221_v50  ;;  %1743 = vmatprep.mubr.msk.f32.mxu1 %vm1957_vm0, %v1956_v0 }
 0x4b2   :  { %v951_v6 = vmul.f32 %v950_v5, %v870_v61  ;;  %1741 = vmatprep.subr.mxu1 %v1956_v0 }
 0x4b3   :  { %1742 = vmatpush3.msra.mxu1 %v2227_v51 }
 0x4b4   :  { %1723 = vmatmul.mubr.msk.f32.vlgmr.msra.gmra.mxu0 %vm149_vm1, %v951_v6  ;;  %1753 = vmatprep.subr.mxu1 %v1956_v0 }
 0x4b5   :  { %1736 = vmatprep.mubr.msk.f32.mxu0 %vm1957_vm0, %v1956_v0  ;;  %1733 = vmatpush3.msra.mxu0 %v1141_v18 }
 0x4b6   :  { %1734 = vmatprep.subr.mxu0 %v1956_v0 }
 0x4b7   :  { %1735 = vmatpush3.msra.mxu0 %v1140_v19 }
 0x4b8   :  { %1746 = vmatprep.subr.mxu0 %v1956_v0 }
 0x4fa   :  { %v2279_v7 = vpop.f32.mrf.mxu1 }
 0x4fc   :  { %v1703_v8 = vpop.f32.mrf.mxu1 }
 0x4fe   :  { %v942_v9 = vpop.f32.mrf.mxu1 }
 0x500   :  { %v1717_v10 = vpop.f32.mrf.mxu1 }
 0x570   :  { %v1117_v11 = vpop.f32.mrf.mxu1 }
 0x571   :  { %1123 = vperm.xlu1 %1776, %v1117_v11  }
 0x572   :  { %v1731_v12 = vpop.f32.mrf.mxu1 }
 0x574   :  { %v1021_v13 = vpop.f32.mrf.mxu0 }
 0x575   :  { %1777 = vset.pattern.permute.xlu1 %v1961_v14  ;;  %1027 = vperm.xlu0 %1778, %v1021_v13  }
 0x576   :  { %1033 = vperm.xlu1 %1777, %v1021_v13   ;;  %v1724_v15 = vpop.f32.mrf.mxu0 }
 0x579   :  { %1780 = vset.pattern.permute.xlu0 %v1961_v14 }
 0x57a   :  { %1133 = vperm.xlu1 %1777, %v1117_v11  }
 0x57e   :  { %1779 = vset.pattern.permute.xlu1 %v1960_v63 }
 0x5ec   :  { %v1124_v16 = vpop.permute.xlu1 %1123 }
 0x5ed   :  { %v1126_v17 = vmul.f32 %v1124_v16, %v2240_v58 }
 0x5ef   :  { %1128 = vrot.lane.b32.xlu1 %v1126_v17, %s1959_s10 }
 0x5f0   :  { %v1028_v23 = vpop.permute.xlu0 %1027 }
 0x5f1   :  { %v1034_v20 = vpop.permute.xlu1 %1033  ;;  %v1030_v24 = vmul.f32 %v1028_v23, %v2240_v58 }
 0x5f2   :  { %v1036_v21 = vmul.f32 %v1034_v20, %v2240_v58 }
 0x5f3   :  { %1335 = vrot.lane.b32.xlu1 %v2190_v45, %s1958_s18  ;;  %v1031_v29 = vadd.f32 %v1030_v24, %v2279_v7 }
 0x5f4   :  { %1038 = vrot.lane.b32.xlu0 %v1036_v21, %s1958_s18 }
 0x5f5   :  { %v1134_v22 = vpop.permute.xlu1 %1133 }
 0x5f6   :  { %v1136_v26 = vmul.f32 %v1134_v22, %v2240_v58 }
 0x5f8   :  { %1239 = vrot.lane.b32.xlu0 %v2190_v45, %s1959_s10 }
 0x661   :  { %v1129_v25 = vpop.permute.xlu1 %1128 }
 0x662   :  { %v1131_v27 = vadd.f32 %v1129_v25, %v2279_v7 }
 0x664   :  { %v1137_v28 = vadd.f32 %v1136_v26, %v1131_v27 }
 0x665   :  { %v1336_v35 = vpop.permute.xlu1 %1335 }
 0x666   :  { %v1039_v30 = vpop.permute.xlu0 %1038  ;;  %1784 = vtanh.f32 %v1137_v28  ;;  %v1338_v38 = vsel %vm949_vm5, %v1336_v35, %v2190_v45 }
 0x667   :  { %v1041_v31 = vadd.f32 %v1039_v30, %v1031_v29  ;;  %v1339_v40 = vmul.f32 %v1338_v38, %v942_v9 }
 0x669   :  { %1786 = vtanh.f32 %v1041_v31 }
 0x66a   :  { %v1240_v32 = vpop.permute.xlu0 %1239 }
 0x66b   :  { %v1242_v33 = vsel %vm949_vm5, %v2190_v45, %v1240_v32 }
 0x66c   :  { %v1243_v34 = vmul.f32 %v1242_v33, %v942_v9 }
 0x66e   :  { %1744 = vmatmul.mubr.msk.f32.vlgmr.msra.gmra.mxu1 %vm149_vm1, %v1243_v34 }
 0x66f   :  { %1757 = vmatprep.mubr.msk.f32.mxu1 %vm1957_vm0, %v1956_v0 }
 0x673   :  { %v1785_v36 = vpop.eup %1784 }
 0x676   :  { %v1787_v37 = vpop.eup %1786 }
 0x677   :  { %v1139_v39 = vsel %vm949_vm5, %v1787_v37, %v1785_v36 }
 0x678   :  { %1737 = vmatmul.mubr.msk.f32.vlgmr.msra.gmra.mxu0 %vm149_vm1, %v1139_v39 }
 0x679   :  { %1747 = vmatpush3.msra.mxu0 %v2221_v50  ;;  %1750 = vmatprep.mubr.msk.f32.mxu0 %vm1957_vm0, %v1956_v0  ;;  %v1433_v50 = vld [vmem:[%s2376_s20 + $0x8] sm:$0xff] }
 0x67a   :  { %1748 = vmatprep.subr.mxu0 %v1956_v0  ;;  %1754 = vmatpush3.msra.mxu1 %v1433_v50 }
 0x67b   :  { %1749 = vmatpush3.msra.mxu0 %v2227_v51  ;;  %v1432_v51 = vld [vmem:[%s2376_s20] sm:$0xff]  ;;  %1755 = vmatprep.subr.mxu1 %v1956_v0  ;;  %s1962_s20 = smov 16  }
 0x67c   :  { %1751 = vmatmul.mubr.msk.f32.vlgmr.msra.gmra.mxu0 %vm149_vm1, %v1339_v40  ;;  %1756 = vmatpush3.msra.mxu1 %v1432_v51 }
 0x72e   :  { %v1313_v41 = vpop.f32.mrf.mxu1 }
 0x72f   :  { %1325 = vperm.xlu0 %1780, %v1313_v41  }
 0x730   :  { %v1745_v42 = vpop.f32.mrf.mxu1 }
 0x738   :  { %v1211_v43 = vpop.f32.mrf.mxu0 }
 0x739   :  { %v1216_v54 = vsel %vm1215_vm6, %v1211_v43, -inf }
 0x73a   :  { %v1738_v44 = vpop.f32.mrf.mxu0 }
 0x73c   :  { %v1409_v46 = vpop.f32.mrf.mxu0 }
 0x73d   :  { %1415 = vperm.xlu1 %1779, %v1409_v46  }
 0x73e   :  { %v1752_v47 = vpop.f32.mrf.mxu0 }
 0x741   :  { %1319 = vperm.xlu1 %1779, %v1313_v41  }
 0x745   :  { %1781 = vset.pattern.permute.xlu1 %v1961_v14 }
 0x746   :  { %1425 = vperm.xlu1 %1781, %v1409_v46  }
 0x74a   :  { %1782 = vset.pattern.permute.xlu1 %v1960_v63 }
 0x7aa   :  { %v1326_v48 = vpop.permute.xlu0 %1325 }
 0x7ab   :  { %v1328_v49 = vmul.f32 %v1326_v48, %v2240_v58 }
 0x7ad   :  { %1330 = vrot.lane.b32.xlu1 %v1328_v49, %s1958_s18 }
 0x7b8   :  { %v1416_v52 = vpop.permute.xlu1 %1415 }
 0x7b9   :  { %v1418_v53 = vmul.f32 %v1416_v52, %v2240_v58 }
 0x7bb   :  { %1420 = vrot.lane.b32.xlu0 %v1418_v53, %s1959_s10 }
 0x7bc   :  { %v1320_v55 = vpop.permute.xlu1 %1319 }
 0x7bd   :  { %v1322_v59 = vmul.f32 %v1320_v55, %v2240_v58 }
 0x7bf   :  { %v1323_v61 = vadd.f32 %v1322_v59, %v2279_v7 }
 0x7c1   :  { %v1426_v57 = vpop.permute.xlu1 %1425 }
 0x7c2   :  { %v1428_v0 = vmul.f32 %v1426_v57, %v2240_v58 }
 0x7da   :  { %1217 = vmax.xlane.f32.xlu0 %v1216_v54 }
 0x81f   :  { %v1331_v60 = vpop.permute.xlu1 %1330 }
 0x820   :  { %v1333_v62 = vadd.f32 %v1331_v60, %v1323_v61 }
 0x822   :  { %1788 = vtanh.f32 %v1333_v62 }
 0x82d   :  { %v1421_v63 = vpop.permute.xlu0 %1420 }
 0x82e   :  { %v1423_v1 = vadd.f32 %v1421_v63, %v2279_v7 }
 0x82f   :  { %v1789_v3 = vpop.eup %1788 }
 0x830   :  { %v1429_v2 = vadd.f32 %v1428_v0, %v1423_v1 }
 0x832   :  { %1790 = vtanh.f32 %v1429_v2 }
 0x83f   :  { %v1791_v4 = vpop.eup %1790 }
 0x840   :  { %v1431_v5 = vsel %vm949_vm5, %v1789_v3, %v1791_v4 }
 0x841   :  { %1758 = vmatmul.mubr.msk.f32.vlgmr.msra.gmra.mxu1 %vm149_vm1, %v1431_v5 }
 0x863   :  { %v1218_v6 = vpop.xlane.xlu0 %1217 }
 0x864   :  { %v1219_v8 = vsub.f32 %v1211_v43, %v1218_v6 }
 0x866   :  { %v1220_v9 = vmul.f32 1.442695, %v1219_v8 }
 0x868   :  { %1792 = vpow2.f32 %v1220_v9 }
 0x875   :  { %v1793_v10 = vpop.eup %1792 }
 0x876   :  { %v1222_v11 = vsel %vm1215_vm6, %v1793_v10, 0.0 }
 0x877   :  { %1223 = vadd.xlane.f32.xlu0 %v1222_v11 }
 0x900   :  { %v1224_v58 = vpop.xlane.xlu0 %1223 }
 0x901   :  { %v1503_v12 = vpop.f32.mrf.mxu1  ;;  %1794 = vrcp.f32 %v1224_v58 }
 0x902   :  { %v1507_v7 = vsel %vm1215_vm6, %v1503_v12, -inf }
 0x903   :  { %1508 = vmax.xlane.f32.xlu1 %v1507_v7  ;;  %v1759_v13 = vpop.f32.mrf.mxu1 }
 0x90e   :  { %v1795_v15 = vpop.eup %1794 }
 0x90f   :  { %v1226_v16 = vmul.f32 %v1795_v15, %v1793_v10 }
 0x914   :  { %1229 = vperm.xlu1 %1782, %v1226_v16  }
 0x98c   :  { %v1509_v17 = vpop.xlane.xlu1 %1508 }
 0x98d   :  { %v1510_v18 = vsub.f32 %v1503_v12, %v1509_v17 }
 0x98f   :  { %v1511_v19 = vmul.f32 1.442695, %v1510_v18 }
 0x990   :  { %v1230_v26 = vpop.permute.xlu1 %1229 }
 0x991   :  { %1796 = vpow2.f32 %v1511_v19  ;;  %v1232_v28 = vmul.f32 %v1230_v26, %v2190_v45 }
 0x99e   :  { %v1797_v20 = vpop.eup %1796 }
 0x99f   :  { %v1513_v21 = vsel %vm1215_vm6, %v1797_v20, 0.0 }
 0x9a0   :  { %1514 = vadd.xlane.f32.xlu0 %v1513_v21 }
 0x9b6   :  { %1234 = vperm.xlu0 %1780, %v1226_v16  }
 0x9ba   :  { %1530 = vrot.lane.b32.xlu0 %v2235_v56, %s1962_s20 }
 0xa29   :  { %v1515_v22 = vpop.xlane.xlu0 %1514 }
 0xa2a   :  { %1798 = vrcp.f32 %v1515_v22 }
 0xa31   :  { %v1235_v25 = vpop.permute.xlu0 %1234 }
 0xa32   :  { %v1237_v27 = vmul.f32 %v1235_v25, %v2190_v45 }
 0xa34   :  { %v1238_v29 = vsel %vm949_vm5, %v1232_v28, %v1237_v27 }
 0xa35   :  { %v1531_v35 = vpop.permute.xlu0 %1530 }
 0xa37   :  { %v1799_v23 = vpop.eup %1798 }
 0xa38   :  { %v1517_v24 = vmul.f32 %v1799_v23, %v1797_v20 }
 0xa3a   :  { %1520 = vperm.xlu1 %1782, %v1517_v24  }
 0xa3e   :  { %1783 = vset.pattern.permute.xlu1 %v1961_v14  ;;  %v1541_v14 = vsel %vm149_vm1, %v2190_v45, %v1531_v35 }
 0xa3f   :  { %1525 = vperm.xlu1 %1783, %v1517_v24  }
 0xa43   :  { %1534 = vrot.lane.b32.xlu1 %v1238_v29, %s1963_s9 }
 0xab5   :  { %v1521_v30 = vpop.permute.xlu1 %1520 }
 0xab6   :  { %v1523_v32 = vmul.f32 %v1521_v30, %v2235_v56 }
 0xaba   :  { %v1526_v31 = vpop.permute.xlu1 %1525 }
 0xabb   :  { %v1528_v33 = vmul.f32 %v1526_v31, %v2235_v56 }
 0xabd   :  { %v1529_v34 = vsel %vm949_vm5, %v1523_v32, %v1528_v33 }
 0xabe   :  { %1538 = vrot.lane.b32.xlu0 %v1529_v34, %s1964_s11  ;;  %v1535_v36 = vpop.permute.xlu1 %1534 }
 0xabf   :  { %v1542_v37 = vsel %vm235_vm2, %v1541_v14, %v1535_v36 }
 0xb30   :  { %v1539_v38 = vpop.permute.xlu0 %1538 }
 0xb31   :  { %v1544_v39 = vsel %vm1543_vm7, %v1542_v37, %v1539_v38 }
 0xb32   :  { %1546 = vst.msk [vmem:[#allocation13] sm:$0xff] %vm1545_vm8, %v1544_v39 }
 0xb33   :  { %1931 = shalt.err (!%p1928_p6)
}
 0xb34   :  { %1556 = dma.vmem_to_hbm [thread:$0]  %s1554_s30, 128, %s2377_s21, [#allocation4]  }
 0xb35   :  { %1948 = dma.done.wait [#allocation4], 128  }
 0xb36   :  { %1949 = vsyncadd [#allocation4], 4294967168 }
 0xb37   :  { %1560 = vsyncpa [#allocation3], 1 }
 0xb38   :  { %1561 = vsyncpa [#allocation6], 1 }
 0xb39   :  { %1562 = vsyncpa [#allocation9], 1 }
 0xb3a   :  { %1563 = vsyncpa [#allocation12], 1 }
 0xb3b   :  { %1564 = vsyncpa [#allocation4], 1 }

</bundles_post_ra>
